<compile_context>
chip_gen: v5e
topology: v5e:2x2
jax: 0.10.0
libtpu: 0.0.40
codegen_flags: <defaults>
</compile_context>

<pallas_src>
import functools

import jax
import jax.numpy as jnp
from jax.experimental import pallas as pl
from jax.experimental.pallas import tpu as pltpu


def _round_up(x, m):
    return ((x + m - 1) // m) * m


def _elementwise_int_pow(x, p):
    """x**p via repeated VPU multiplies when p is a small integer (avoids EUP exp/log)."""
    ip = int(round(float(p)))
    if abs(float(p) - ip) < 1e-12 and 1 <= ip <= 8:
        r = x
        for _ in range(ip - 1):
            r = r * x
        return r
    return jnp.power(x, p)  # non-integer exponent: fall back to pow


def _gem_linear_kernel(x_ref, w_ref, b_ref, o_ref, acc_ref, *,
                       pool_param: float, pool: str, inv_hw: float):
    # x_ref:   (B, hw_tile, C) feature block -- C on the 128-lane axis, HW on sublanes
    # w_ref:   (C, D) linear weight (transposed vs torch's (D, C)), grid-invariant
    # b_ref:   (1, D) bias, grid-invariant
    # o_ref:   (1, B, D) output block (lane-dense, any B)
    # acc_ref: (B, C) f32 running sum of x^p over the HW reduction axis
    hw_idx = pl.program_id(1)

    @pl.when(hw_idx == 0)
    def _():
        acc_ref[...] = jnp.zeros_like(acc_ref)

    # Upcast per-vreg for elementwise math (v5e VPU has no bf16); accumulate in f32.
    x = x_ref[...].astype(jnp.float32)
    x = jnp.maximum(x, 1e-6)                      # clamp(min=1e-6)
    if pool == "gem":
        xp = _elementwise_int_pow(x, pool_param)  # p=3 -> x*x*x on the VPU
    else:                                         # plain average pool
        xp = x
    acc_ref[...] += jnp.sum(xp, axis=1)           # cheap sublane reduction -> (B, C)

    @pl.when(hw_idx == pl.num_programs(1) - 1)
    def _():
        pooled = acc_ref[...] * inv_hw            # mean over the true H*W
        if pool == "gem":
            pooled = jnp.power(pooled, 1.0 / pool_param)  # tiny (B, C) root only
        w = w_ref[...]
        # Keep the MXU on its native bf16 path when bf16 weights were requested.
        lhs = pooled if w.dtype == jnp.float32 else pooled.astype(w.dtype)
        y = jnp.dot(lhs, w, preferred_element_type=jnp.float32)
        y = y + b_ref[...].astype(jnp.float32)
        o_ref[...] = y[None, :, :].astype(o_ref.dtype)


def _vmem_budget_bytes():
    """Per-generation VMEM budget with headroom (v7x-safe fallback if query fails)."""
    cap = 64 * 1024 * 1024  # v7x per-TensorCore VMEM: safe lower bound everywhere
    try:
        cap = int(pltpu.get_tpu_info().vmem_capacity_bytes)
    except Exception:
        pass
    return min(int(cap * 0.70), 96 * 1024 * 1024)


def _choose_tiling(N, C, D, HW, feat_itemsize, w_itemsize, budget_bytes):
    """Pick (batch block B, hw_tile) from the real lane/sublane-padded VMEM footprint."""
    sub = 16 if feat_itemsize <= 2 else 8          # sublane quantum of the feature dtype
    c_pad = _round_up(C, 128)
    d_pad = _round_up(D, 128)

    # Grid-invariant weight + bias, counted double-buffered to be safe.
    const_bytes = 2 * (c_pad * d_pad * w_itemsize + 8 * d_pad * 4)

    def feat_bytes(b, hw_t):                       # double-buffered feature block
        return 2 * b * _round_up(hw_t, sub) * c_pad * feat_itemsize

    def other_bytes(b):                            # acc scratch + double-buffered output
        return _round_up(b, 8) * (c_pad + 2 * d_pad) * 4

    avail = max(budget_bytes - const_bytes, 1)

    # Largest batch block (<= 32) whose full-HW feature block fits; keep >= 2 batch
    # grid steps when N >= 2 so both v7x TensorCores get work on the parallel axis.
    b_cap = max(1, min(N, 32))
    if N >= 2:
        b_cap = min(b_cap, -(-N // 2))             # cdiv(N, 2)
    B = 1
    for b in range(b_cap, 0, -1):
        if feat_bytes(b, HW) + other_bytes(b) <= avail:
            B = b
            break

    # Tile the HW reduction axis only if even the chosen B doesn't fit with full HW.
    hw_tile = HW
    if feat_bytes(B, HW) + other_bytes(B) > avail:
        room = max(avail - other_bytes(B), 1)
        max_hw = room // (2 * B * c_pad * feat_itemsize)
        hw_tile = max(sub, (max_hw // sub) * sub)  # multiple of the sublane quantum
        hw_tile = min(hw_tile, HW)
    return B, hw_tile


def sscd_head(features, weight_dc, bias_d, *, pool_param=3.0, pool="gem",
              channels_last=False, matmul_dtype=jnp.bfloat16):
    """GeM/Avg-pool + Linear embedding head of SSCDModel.

    Args:
      features:   (N, C, H, W) backbone features (PyTorch NCHW), or (N, H, W, C) if
                  channels_last=True (preferred; avoids the one-time transpose).
      weight_dc:  (D, C) torch-style nn.Linear weight.
      bias_d:     (D,)   nn.Linear bias.
      matmul_dtype: dtype used for the MXU matmul (bf16 default; pass jnp.float32
                  for an exact match of the f32 nn.Linear).
    Returns:
      (N, D) float32 embeddings, matching SSCDModel(...).forward after the backbone.
    """
    if channels_last:
        N, H, W, C = features.shape
        x = features.reshape(N, H * W, C)          # free reshape, already lane-dense
    else:
        N, C, H, W = features.shape
        # Channels-last block layout: C on the 128-lane axis, HW on sublanes.
        x = jnp.transpose(features.reshape(N, C, H * W), (0, 2, 1))
    D = weight_dc.shape[0]
    HW = H * W

    w = jnp.transpose(weight_dc, (1, 0)).astype(matmul_dtype)   # (C, D), bf16 default
    b = bias_d.reshape(1, D).astype(jnp.float32)

    budget = _vmem_budget_bytes()
    B, hw_tile = _choose_tiling(N, C, D, HW,
                                jnp.dtype(x.dtype).itemsize,
                                jnp.dtype(w.dtype).itemsize, budget)

    n_blocks = pl.cdiv(N, B)
    n_pad = n_blocks * B
    hw_pad = pl.cdiv(HW, hw_tile) * hw_tile
    if n_pad != N or hw_pad != HW:
        # Zero padding is safe: padded batch rows are sliced off; padded HW positions
        # clamp to 1e-6 and contribute <=1e-18 (gem) / ~1e-7 (avg) to the mean.
        x = jnp.pad(x, ((0, n_pad - N), (0, hw_pad - HW), (0, 0)))

    kernel = functools.partial(
        _gem_linear_kernel,
        pool_param=float(pool_param), pool=pool, inv_hw=1.0 / float(HW))

    out = pl.pallas_call(
        kernel,
        out_shape=jax.ShapeDtypeStruct((n_blocks, B, D), jnp.float32),
        grid_spec=pltpu.PrefetchScalarGridSpec(
            num_scalar_prefetch=0,
            grid=(n_blocks, hw_pad // hw_tile),
            in_specs=[
                pl.BlockSpec((B, hw_tile, C), lambda n, h: (n, h, 0)),
                pl.BlockSpec((C, D), lambda n, h: (0, 0)),   # grid-invariant weight
                pl.BlockSpec((1, D), lambda n, h: (0, 0)),   # grid-invariant bias
            ],
            out_specs=pl.BlockSpec((1, B, D), lambda n, h: (n, 0, 0)),
            scratch_shapes=[pltpu.VMEM((B, C), jnp.float32)],
        ),
        compiler_params=pltpu.CompilerParams(
            dimension_semantics=("parallel", "arbitrary"),
            vmem_limit_bytes=int(budget),
        ),
    )(x, w, b)
    return out.reshape(n_pad, D)[:N]


def reference_head(features_nchw, weight_dc, bias_d, *, pool_param=3.0, pool="gem"):
    """Pure-JAX reference mirroring the PyTorch module (GeM/Avg pool + Linear)."""
    N, C, H, W = features_nchw.shape
    xf = features_nchw.reshape(N, C, H * W).astype(jnp.float32)
    xf = jnp.clip(xf, 1e-6, None)
    if pool == "gem":
        pooled = jnp.mean(jnp.power(xf, pool_param), axis=2) ** (1.0 / pool_param)
    else:
        pooled = jnp.mean(xf, axis=2)
    return pooled @ weight_dc.T.astype(jnp.float32) + bias_d.astype(jnp.float32)


if __name__ == "__main__":
    # Small shapes consistent with the module structure (real model: C=2048, D=512, HW=49).
    N, C, H, W = 2, 256, 4, 4
    D = 128
    pool_param = 3.0

    key = jax.random.PRNGKey(0)
    k_feat, k_w = jax.random.split(key, 2)

    # Backbone features are non-negative (post-ReLU) in the real model.
    feats = jax.nn.relu(jax.random.normal(k_feat, (N, C, H, W), dtype=jnp.float32))

    # Deterministic init mirroring SSCDModel._init_weights: weight ~ N(0, 0.02), bias = 0.
    weight = 0.02 * jax.random.normal(k_w, (D, C), dtype=jnp.float32)
    bias = jnp.zeros((D,), dtype=jnp.float32)

    ref_gem = reference_head(feats, weight, bias, pool_param=pool_param, pool="gem")
    ref_avg = reference_head(feats, weight, bias, pool_param=pool_param, pool="avg")

    # Default fast path: bf16 weights on the MXU (small deliberate deviation from the
    # f32 nn.Linear -- validated with a bf16-appropriate tolerance).
    out = jax.block_until_ready(
        sscd_head(feats, weight, bias, pool_param=pool_param, pool="gem"))
    assert out.shape == (N, D)
    assert jnp.allclose(out, ref_gem, atol=1e-2, rtol=1e-2), \
        float(jnp.max(jnp.abs(out - ref_gem)))

    # Exact f32-matmul path matches the PyTorch head tightly.
    out_f32 = jax.block_until_ready(
        sscd_head(feats, weight, bias, pool_param=pool_param, pool="gem",
                  matmul_dtype=jnp.float32))
    assert jnp.allclose(out_f32, ref_gem, atol=1e-4, rtol=1e-4), \
        float(jnp.max(jnp.abs(out_f32 - ref_gem)))

    # AvgPool2d head variant.
    out_avg = jax.block_until_ready(
        sscd_head(feats, weight, bias, pool_param=pool_param, pool="avg",
                  matmul_dtype=jnp.float32))
    assert jnp.allclose(out_avg, ref_avg, atol=1e-4, rtol=1e-4), \
        float(jnp.max(jnp.abs(out_avg - ref_avg)))

    # bf16 backbone features (halves HBM-roofline traffic); compare against the
    # reference evaluated on the bf16-rounded features.
    feats_bf16 = feats.astype(jnp.bfloat16)
    ref_bf16 = reference_head(feats_bf16.astype(jnp.float32), weight, bias,
                              pool_param=pool_param, pool="gem")
    out_bf16 = jax.block_until_ready(
        sscd_head(feats_bf16, weight, bias, pool_param=pool_param, pool="gem"))
    assert jnp.allclose(out_bf16, ref_bf16, atol=1e-2, rtol=1e-2), \
        float(jnp.max(jnp.abs(out_bf16 - ref_bf16)))

    print("KERNEL_OK")
</pallas_src>

<mosaic_0001>
module attributes {stable_mosaic.version = 11 : i64} {
  func.func @_gem_linear_kernel(%arg0: i32, %arg1: i32, %arg2: memref<1x16x256xf32, #tpu.memory_space<vmem>>, %arg3: memref<256x128xbf16, #tpu.memory_space<vmem>>, %arg4: memref<1x128xf32, #tpu.memory_space<vmem>>, %arg5: memref<1x1x128xf32, #tpu.memory_space<vmem>>, %arg6: memref<1x256xf32, #tpu.memory_space<vmem>>) attributes {dimension_semantics = [#tpu.dimension_semantics<parallel>, #tpu.dimension_semantics<arbitrary>], iteration_bounds = array<i64: 2, 1>, scalar_prefetch = 0 : i64, scratch_operands = 1 : i64, tpu.core_type = #tpu.core_type<tc>, window_params = [{transform_indices = @transform_0, window_bounds = array<i64: 1, 16, 256>}, {pipeline_mode = #tpu.pipeline_mode<synchronous>, transform_indices = @transform_1, window_bounds = array<i64: 256, 128>}, {pipeline_mode = #tpu.pipeline_mode<synchronous>, transform_indices = @transform_2, window_bounds = array<i64: 1, 128>}, {transform_indices = @transform_3, window_bounds = array<i64: 1, 1, 128>}]} {
    %c0_i32 = arith.constant 0 : i32
    %0 = arith.cmpi eq, %arg1, %c0_i32 : i32
    %1 = arith.extui %0 : i1 to i32
    %c0_i32_0 = arith.constant 0 : i32
    %2 = arith.cmpi ne, %1, %c0_i32_0 : i32
    scf.if %2 {
      %cst_10 = arith.constant 0.000000e+00 : f32
      %15 = vector.broadcast %cst_10 : f32 to vector<1x256xf32>
      %c0_11 = arith.constant 0 : index
      %c0_12 = arith.constant 0 : index
      %16 = vector.load %arg6[%c0_11, %c0_12] : memref<1x256xf32, #tpu.memory_space<vmem>>, vector<1x256xf32>
      tpu.vector_store %arg6[%c0_11, %c0_12], %15 {strides = array<i32>} : memref<1x256xf32, #tpu.memory_space<vmem>>, vector<1x256xf32>,
    } else {
    }
    %c0 = arith.constant 0 : index
    %c0_1 = arith.constant 0 : index
    %c0_2 = arith.constant 0 : index
    %3 = vector.load %arg2[%c0, %c0_1, %c0_2] : memref<1x16x256xf32, #tpu.memory_space<vmem>>, vector<1x16x256xf32>
    %cst = arith.constant 9.99999997E-7 : f32
    %4 = vector.broadcast %cst : f32 to vector<1x16x256xf32>
    %5 = arith.maximumf %3, %4 : vector<1x16x256xf32>
    %6 = arith.mulf %5, %5 : vector<1x16x256xf32>
    %7 = arith.mulf %6, %5 : vector<1x16x256xf32>
    %c0_3 = arith.constant 0 : index
    %c0_4 = arith.constant 0 : index
    %8 = vector.load %arg6[%c0_3, %c0_4] : memref<1x256xf32, #tpu.memory_space<vmem>>, vector<1x256xf32>
    %cst_5 = arith.constant dense<0.000000e+00> : vector<1x256xf32>
    %9 = vector.multi_reduction <add>, %7, %cst_5 [1] : vector<1x16x256xf32> to vector<1x256xf32>
    %10 = arith.addf %8, %9 : vector<1x256xf32>
    %c0_6 = arith.constant 0 : index
    %c0_7 = arith.constant 0 : index
    %11 = vector.load %arg6[%c0_6, %c0_7] : memref<1x256xf32, #tpu.memory_space<vmem>>, vector<1x256xf32>
    tpu.vector_store %arg6[%c0_6, %c0_7], %10 {strides = array<i32>} : memref<1x256xf32, #tpu.memory_space<vmem>>, vector<1x256xf32>,
    %c0_i32_8 = arith.constant 0 : i32
    %12 = arith.cmpi eq, %arg1, %c0_i32_8 : i32
    %13 = arith.extui %12 : i1 to i32
    %c0_i32_9 = arith.constant 0 : i32
    %14 = arith.cmpi ne, %13, %c0_i32_9 : i32
    scf.if %14 {
      %c0_10 = arith.constant 0 : index
      %c0_11 = arith.constant 0 : index
      %15 = vector.load %arg6[%c0_10, %c0_11] : memref<1x256xf32, #tpu.memory_space<vmem>>, vector<1x256xf32>
      %cst_12 = arith.constant 6.250000e-02 : f32
      %16 = vector.broadcast %cst_12 : f32 to vector<1x256xf32>
      %17 = arith.mulf %15, %16 : vector<1x256xf32>
      %cst_13 = arith.constant 0.333333343 : f32
      %18 = vector.broadcast %cst_13 : f32 to vector<1x256xf32>
      %19 = math.powf %17, %18 : vector<1x256xf32>
      %c0_14 = arith.constant 0 : index
      %c0_15 = arith.constant 0 : index
      %20 = vector.load %arg3[%c0_14, %c0_15] : memref<256x128xbf16, #tpu.memory_space<vmem>>, vector<256x128xbf16>
      %21 = arith.truncf %19 : vector<1x256xf32> to vector<1x256xbf16>
      %cst_16 = arith.constant dense<0.000000e+00> : vector<1x128xf32>
      %22 = tpu.matmul %21, %20, %cst_16 {dimension_numbers = #tpu.dot_dimension_numbers<[1], [0], [0], [1], [0, 0, 1, 1], [], []>} : vector<1x256xbf16>, vector<256x128xbf16>, vector<1x128xf32> -> vector<1x128xf32>
      %c0_17 = arith.constant 0 : index
      %c0_18 = arith.constant 0 : index
      %23 = vector.load %arg4[%c0_17, %c0_18] : memref<1x128xf32, #tpu.memory_space<vmem>>, vector<1x128xf32>
      %24 = arith.addf %22, %23 : vector<1x128xf32>
      %25 = vector.shape_cast %24 : vector<1x128xf32> to vector<1x1x128xf32>
      %c0_19 = arith.constant 0 : index
      %c0_20 = arith.constant 0 : index
      %c0_21 = arith.constant 0 : index
      %26 = vector.load %arg5[%c0_19, %c0_20, %c0_21] : memref<1x1x128xf32, #tpu.memory_space<vmem>>, vector<1x1x128xf32>
      tpu.vector_store %arg5[%c0_19, %c0_20, %c0_21], %25 {strides = array<i32>} : memref<1x1x128xf32, #tpu.memory_space<vmem>>, vector<1x1x128xf32>,
    } else {
    }
    return
  }
  func.func @transform_0(%arg0: i32, %arg1: i32) -> (i32, i32, i32) {
    %c0_i32 = arith.constant 0 : i32
    %c0_i32_0 = arith.constant 0 : i32
    return %arg0, %arg1, %c0_i32 : i32, i32, i32
  }
  func.func @transform_1(%arg0: i32, %arg1: i32) -> (i32, i32) {
    %c0_i32 = arith.constant 0 : i32
    %c0_i32_0 = arith.constant 0 : i32
    %c0_i32_1 = arith.constant 0 : i32
    return %c0_i32, %c0_i32_0 : i32, i32
  }
  func.func @transform_2(%arg0: i32, %arg1: i32) -> (i32, i32) {
    %c0_i32 = arith.constant 0 : i32
    %c0_i32_0 = arith.constant 0 : i32
    %c0_i32_1 = arith.constant 0 : i32
    return %c0_i32, %c0_i32_0 : i32, i32
  }
  func.func @transform_3(%arg0: i32, %arg1: i32) -> (i32, i32, i32) {
    %c0_i32 = arith.constant 0 : i32
    %c0_i32_0 = arith.constant 0 : i32
    %c0_i32_1 = arith.constant 0 : i32
    return %arg0, %c0_i32, %c0_i32_0 : i32, i32, i32
  }
}

</mosaic_0001>

<bundles_post_ra>
// kernel: tpu_custom_call.1
= control target key start
LH: loop header
LB: loop body
LE: loop exit
PB: predicated region body
PF: predicated region fallthrough
CT: control target
= control target key end

     0   :  { %s1081_s0 = inlined_call_operand.hbm [shape: f32[2,16,256], index: 0, kind: input, shape index: {}]   ;;  %s1082_s1 = inlined_call_operand.hbm [shape: bf16[256,128], index: 1, kind: input, shape index: {}]   ;;  %s1083_s2 = inlined_call_operand.vmem [shape: f32[1,128], index: 2, kind: input, shape index: {}]   ;;  %s1084_s3 = inlined_call_operand.hbm [shape: f32[2,1,128], index: 3, kind: output, shape index: {}]  }
   0x1   :  { %1085 = sst [smem:[#allocation12_spill]] %s1082_s1 }
   0x2   :  { %8 = vsyncpa [#allocation4], 0 }
   0x3   :  { %10 = vsyncpa [#allocation4 + $0x1], 0 }
   0x4   :  { %11 = vsyncpa [#allocation7], 0 }
   0x5   :  { %12 = vsyncpa [#allocation5], 0 }
   0x6   :  { %14 = vsyncpa [#allocation5 + $0x1], 0  ;;  %s920_s12 = smov 0   ;;  %s922_s13 = smov 0  }
   0x7   :  { %s924_s14 = smov 0   ;;  %s926_s15 = smov 0  }
   0x8   :  { %s928_s16 = smov 0   ;;  %s930_s17 = smov 0  }
   0x9 LB: > { %s546_s18 = sadd.s32 4294967295, %s892_s17   ;;  %s547_s19 = sadd.s32 4294967294, %s892_s17   ;;  %s892_s17 = sphi %s930_s17, %s20_s17   ;;  %s888_s16 = sphi %s928_s16, %s1100_s16   ;;  %s884_s15 = sphi %s926_s15, %s1099_s15   ;;  %s880_s14 = sphi %s924_s14, %s1098_s14   ;;  %s876_s13 = sphi %s922_s13, %s1097_s13   ;;  %s872_s12 = sphi %s920_s12, %s1096_s12  }
   0xa   : > { %p54_p0 = scmp.ne.s32.totalorder %s876_s13, %s872_s12  ;;  %p954_p1 = scmp.eq.s32.totalorder %s546_s18, 0 }
   0xb   : > { %p958_p2 = scmp.eq.s32.totalorder %s546_s18, 1  ;;  %p126_p3 = scmp.eq.s32.totalorder %s547_s19, 1 }
   0xc   : > { %p964_p4 = por %p954_p1, %p54_p0  ;;  %p548_p5 = scmp.ge.s32.totalorder %s892_s17, 1 }
   0xd   : > { %p969_p6 = por %p126_p3, %p54_p0  ;;  %p133_p7 = scmp.lt.s32.totalorder %s892_s17, 3 }
   0xe   : > { %s1090_s1 = sld [smem:[#allocation12_spill]]  ;;  %s894_s28 = smov [#allocation6]  }
   0xf   : > { %p977_p8 = pnand %p548_p5, %p133_p7  ;;  %s146_s29 = sshll.u32 %s894_s28, 4  ;;  %s147_s29 = int_to_ptr.vmem [resolvable:$true] %s146_s29 }
  0x10   : > { %p550_p11 = scmp.ge.s32.totalorder %s892_s17, 2  ;;  %s895_s30 = smov 64  }
  0x11   : > { %p672_p9 = pneg %p977_p8  ;;  %s896_s4 = smov 4  }
  0x12   : > { %s32_s5 = sadd.s32 1, %s888_s16  ;;  %s41_s6 = sadd.s32 1, %s880_s14 }
  0x13   : > { %p673_p10 = pnand %p672_p9, %p954_p1  ;;  %p34_p12 = scmp.ge.s32.totalorder %s32_s5, 2 }
  0x14   : > { %s144_s26 = sshll.u32 %s1090_s1, 4  ;;  %p48_p13 = scmp.ne.s32.totalorder %s880_s14, %s876_s13  ;;  %s145_s26 = int_to_ptr.hbm [resolvable:$true] %s144_s26 }
  0x15   : > { %675 = dma.hbm_to_vmem [thread:$0]  (!%p673_p10), %s145_s26, 2048, %s147_s29, [#allocation7], %s895_s30, %s895_s30, %s896_s4  }
  0x16   : > { %p49_p0 = scmp.eq.s32.totalorder %s892_s17, 0  ;;  %s1102_s5 = smov (%p34_p12, %s32_s5), 0 }
  0x17   : > { %p999_p5 = por %p958_p2, %p48_p13  ;;  %s36_s9 = ssub.s32 %s888_s16, %s1102_s5 }
  0x18   : > { %p993_p3 = por %p49_p0, %p48_p13  ;;  %p685_p7 = scmp.lt.s32.totalorder %s892_s17, 2 }
  0x19   : > { %p39_p9 = scmp.eq.s32.totalorder %s36_s9, 0  ;;  %s163_s10 = sand.u32 1, %s880_s14  }
  0x1a   : > { %s551_s11 = sshll.u32 %s163_s10, 5  ;;  %s623_s19 = sshll.u32 %s888_s16, 5 }
  0x1b   : > { %s1008_s18 = scalar_select %p39_p9, %s880_s14, %s41_s6  }
  0x1c   : > { %s175_s26 = scalar_lea.hbm %s1081_s0, %s623_s19  ;;  %s167_s28 = scalar_lea.vmem [#allocation3], %s551_s11 }
  0x1d   : > { %s178_s29 = sshll.u32 %s167_s28, 4  ;;  %s176_s21 = sshll.u32 %s175_s26, 4  ;;  %s179_s29 = int_to_ptr.vmem [resolvable:$true] %s178_s29  ;;  %s177_s21 = int_to_ptr.hbm [resolvable:$true] %s176_s21 }
  0x1e   : > { %p677_p2 = pnand %p685_p7, %p993_p3  ;;  %s164_s30 = scalar_lea.sflag [#allocation4], %s163_s10 }
  0x1f   : > { %s897_s4 = smov 256   ;;  %s898_s1 = smov 16  }
  0x20   : > { %679 = dma.hbm_to_vmem [thread:$0]  (!%p677_p2), %s177_s21, 512, %s179_s29, %s164_s30, %s897_s4, %s897_s4, %s898_s1  }
  0x21   : > { %190 = sbr.rel (%p977_p8) target bundleno = 257 (0x101), region = 32  ;;  %s1019_s6 = sand.u32 (!%p977_p8), 1, %s876_s13  }
  0x22   : > { %s555_s9 = sshll.u32 (!%p977_p8), %s1019_s6, 5  ;;  %s193_s11 = scalar_lea.sflag (!%p977_p8), [#allocation4], %s1019_s6 }
  0x23   : > { %s196_s19 = scalar_lea.vmem (!%p977_p8), [#allocation3], %s555_s9 }
  0x26   : > { %859 = dma.done.wait (%p964_p4), %s193_s11, 512  }
  0x27   : > { %861 = vsyncadd (%p964_p4), %s193_s11, 4294966784 }
  0x28   : > { %863 = dma.done.wait (%p954_p1), [#allocation7], 2048  }
  0x29   : > { %865 = vsyncadd (%p954_p1), [#allocation7], 4294965248  ;;  %v229_v0 = vlaneseq  ;;  %v899_v2 = vmov 0.0   ;;  %v631_v3 = vld [vmem:[#allocation6 + $0x38] sm:$0xff]  ;;  %v630_v5 = vld [vmem:[#allocation6 + $0x30] sm:$0xff]  ;;  %vm268_vm1 = vcmask 1040384   ;;  %s455_s22 = scalar_lea.hbm %s1084_s3, %s884_s15 }
  0x2a   : > { %v639_v4 = vld [vmem:[#allocation6 + $0x78] sm:$0xff]  ;;  %419 = vmatpush.bf16.msra.mxu0 %v631_v3  ;;  %v638_v6 = vld [vmem:[#allocation6 + $0x70] sm:$0xff]  ;;  %v629_v7 = vld [vmem:[#allocation6 + $0x28] sm:$0xff]  ;;  %s223_s10 = scalar_lea.vmem [#allocation8], %s1019_s6  ;;  %s459_s25 = sshll.u32 %s455_s22, 4  ;;  %s460_s25 = int_to_ptr.hbm [resolvable:$true] %s459_s25 }
  0x2b   : > { %vm1031_vm0 = vcmp.lt.s32.totalorder %v229_v0, 256  ;;  %432 = vmatpush.bf16.msra.mxu1 %v639_v4  ;;  %v637_v8 = vld [vmem:[#allocation6 + $0x68] sm:$0xff]  ;;  %v234_v9 = vld [vmem:[%s196_s19] sm:$0xff]  ;;  %v236_v11 = vld [vmem:[%s196_s19 + $0x10] sm:$0xff]  ;;  %s457_s24 = sshll.u32 %s223_s10, 4  ;;  %s447_s26 = scalar_lea.sflag [#allocation5], %s1019_s6  ;;  %s458_s24 = int_to_ptr.vmem [resolvable:$true] %s457_s24 }
  0x2c   : > { %233 = vst.msk [vmem:[#allocation2] sm:$0x3] %vm1031_vm0, %v899_v2  ;;  %v235_v10 = vld [vmem:[%s196_s19 + $0x8] sm:$0xff]  ;;  %v237_v12 = vld [vmem:[%s196_s19 + $0x18] sm:$0xff]  ;;  %v238_v13 = vmax.f32 %v234_v9, 1e-06 }
  0x2d   : > { %v239_v14 = vmax.f32 %v235_v10, 1e-06  ;;  %v240_v15 = vmax.f32 %v236_v11, 1e-06  ;;  %v241_v16 = vmax.f32 %v237_v12, 1e-06 }
  0x2e   : > { %420 = vmatpush.bf16.msra.mxu0 %v630_v5  ;;  %v242_v17 = vmul.f32 %v238_v13, %v238_v13  ;;  %v628_v21 = vld [vmem:[#allocation6 + $0x20] sm:$0xff]  ;;  %v627_v29 = vld [vmem:[#allocation6 + $0x18] sm:$0xff]  ;;  %v626_v35 = vld [vmem:[#allocation6 + $0x10] sm:$0xff]  ;;  %s820_s28 = sshra.s32 %s460_s25, 4  ;;  %s826_s30 = scalar_lea.hbm %s1084_s3, 2  ;;  %s821_s28 = int_to_ptr.hbm [resolvable:$true] %s820_s28 }
  0x2f   : > { %433 = vmatpush.bf16.msra.mxu1 %v638_v6  ;;  %v243_v18 = vmul.f32 %v239_v14, %v239_v14  ;;  %v244_v19 = vmul.f32 %v240_v15, %v240_v15  ;;  %v245_v20 = vmul.f32 %v241_v16, %v241_v16  ;;  %v636_v22 = vld [vmem:[#allocation6 + $0x60] sm:$0xff]  ;;  %v635_v30 = vld [vmem:[#allocation6 + $0x58] sm:$0xff]  ;;  %v634_v36 = vld [vmem:[#allocation6 + $0x50] sm:$0xff]  ;;  %s822_s29 = scalar_lea.hbm %s821_s28, 1  ;;  %p827_p10 = scmp.lt.s32.totalorder %s821_s28, %s1084_s3 }
  0x30   : > { %v246_v23 = vmul.f32 %v242_v17, %v238_v13  ;;  %v625_v41 = vld [vmem:[#allocation6 + $0x8] sm:$0xff]  ;;  %v624_v47 = vld [vmem:[#allocation6] sm:$0xff]  ;;  %v322_v13 = vld [vmem:[%s1083_s2] sm:$0x1]  ;;  %p823_p1 = scmp.ne.s32.totalorder %s821_s28, %s822_s29  ;;  %p828_p12 = scmp.lt.s32.totalorder %s826_s30, %s822_s29 }
  0x31   : > { %v247_v24 = vmul.f32 %v243_v18, %v239_v14  ;;  %v248_v25 = vmul.f32 %v244_v19, %v240_v15  ;;  %v249_v26 = vmul.f32 %v245_v20, %v241_v16  ;;  %v633_v42 = vld [vmem:[#allocation6 + $0x48] sm:$0xff]  ;;  %v632_v48 = vld [vmem:[#allocation6 + $0x40] sm:$0xff] }
  0x32   : > { %421 = vmatpush.bf16.msra.mxu0 %v629_v7  ;;  %p824_p4 = pnand %p823_p1, %p999_p5  ;;  %p829_p13 = por %p828_p12, %p827_p10 }
  0x33   : > { %434 = vmatpush.bf16.msra.mxu1 %v637_v8  ;;  %v251_v27 = vadd.f32 %v248_v25, %v246_v23  ;;  %v258_v28 = vadd.f32 %v249_v26, %v247_v24  ;;  %v250_v49 = vld [vmem:[#allocation2] sm:$0x3] }
  0x34   : > { %p825_p8 = pneg %p824_p4 }
  0x35   : > { %v252_v31 = vrot.slane %v251_v27, 4  ;;  %v259_v32 = vrot.slane %v258_v28, 4 }
  0x36   : > { %422 = vmatpush.bf16.msra.mxu0 %v628_v21  ;;  %p830_p0 = pnand %p829_p13, %p825_p8 }
  0x37   : > { %435 = vmatpush.bf16.msra.mxu1 %v636_v22  ;;  %v253_v33 = vadd.f32 %v252_v31, %v251_v27  ;;  %v260_v34 = vadd.f32 %v259_v32, %v258_v28 }
  0x39   : > { %v254_v37 = vrot.slane %v253_v33, 2  ;;  %v261_v38 = vrot.slane %v260_v34, 2 }
  0x3a   : > { %423 = vmatpush.bf16.msra.mxu0 %v627_v29 }
  0x3b   : > { %436 = vmatpush.bf16.msra.mxu1 %v635_v30  ;;  %v255_v39 = vadd.f32 %v254_v37, %v253_v33  ;;  %v262_v40 = vadd.f32 %v261_v38, %v260_v34 }
  0x3d   : > { %v256_v43 = vrot.slane %v255_v39, 1  ;;  %v263_v44 = vrot.slane %v262_v40, 1 }
  0x3e   : > { %424 = vmatpush.bf16.msra.mxu0 %v626_v35 }
  0x3f   : > { %437 = vmatpush.bf16.msra.mxu1 %v634_v36  ;;  %v257_v45 = vadd.f32 %v256_v43, %v255_v39  ;;  %v264_v46 = vadd.f32 %v263_v44, %v262_v40 }
  0x41   : > { %v267_v50 = vrot.slane %v264_v46, 7 }
  0x42   : > { %425 = vmatpush.bf16.msra.mxu0 %v625_v41 }
  0x43   : > { %438 = vmatpush.bf16.msra.mxu1 %v633_v42  ;;  %v269_v51 = vsel %vm268_vm1, %v257_v45, %v267_v50 }
  0x44   : > { %v271_v52 = vadd.f32 %v269_v51, %v250_v49 }
  0x46   : > { %426 = vmatpush.bf16.msra.mxu0 %v624_v47  ;;  %276 = vst.msk [vmem:[#allocation2] sm:$0x3] %vm1031_vm0, %v271_v52 }
  0x47   : > { %439 = vmatpush.bf16.msra.mxu1 %v632_v48 }
  0x4d   : > { %v280_v53 = vld [vmem:[#allocation2] sm:$0x3] }
  0x4e   : > { %v281_v54 = vmul.f32 0.0625, %v280_v53 }
  0x50   : > { %v642_v55 = vand.u32 2147483647, %v281_v54  ;;  %v659_v3 = vand.u32 2147483648, %v281_v54  ;;  %vm641_vm4 = vcmp.lt.f32.partialorder %v281_v54, 0.0  ;;  %vm640_vm5 = vcmp.eq.f32.partialorder %v281_v54, 0.0 }
  0x52   : > { %742 = vlog2.f32 %v642_v55  ;;  %vm656_vm2 = vweird.f32 %v642_v55  ;;  %vm658_vm3 = vcmp.eq.f32.partialorder %v642_v55, 0.0  ;;  %vm643_vm6 = vcmp.eq.f32.partialorder %v642_v55, inf }
  0x58   : > { %v743_v56 = vpop.eup %742 }
  0x59   : > { %v646_v57 = vmul.f32 -0.33333334, %v743_v56 }
  0x5b   : > { %744 = vpow2.f32 %v646_v57 }
  0x61   : > { %v745_v58 = vpop.eup %744 }
  0x62   : > { %v648_v59 = vmul.f32 %v745_v58, %v745_v58 }
  0x64   : > { %v649_v60 = vmul.f32 %v648_v59, %v642_v55 }
  0x66   : > { %v650_v61 = vmul.f32 %v649_v60, %v648_v59 }
  0x68   : > { %v651_v62 = vsub.f32 %v650_v61, %v745_v58 }
  0x6a   : > { %v652_v63 = vmul.f32 -0.33333334, %v651_v62 }
  0x6c   : > { %v653_v0 = vadd.f32 %v745_v58, %v652_v63 }
  0x6e   : > { %v654_v2 = vmul.f32 %v653_v0, %v281_v54 }
  0x70   : > { %v655_v4 = vmul.f32 %v654_v2, %v653_v0 }
  0x72   : > { %v657_v1 = vsel %vm656_vm2, %v281_v54, %v655_v4 }
  0x73   : > { %v660_v5 = vsel %vm658_vm3, %v659_v3, %v657_v1 }
  0x74   : > { %v661_v6 = vsel %vm641_vm4, nan, %v660_v5 }
  0x75   : > { %v662_v7 = vsel %vm640_vm5, 0.0, %v661_v6 }
  0x76   : > { %v663_v8 = vsel %vm643_vm6, inf, %v662_v7 }
  0x77   : > { %v316_v9 = vperm.slane %v663_v8, 0  ;;  %v317_v10 = vperm.slane %v663_v8, 1 }
  0x79   : > { %v320_v11 = vpack.c.bf16 %v316_v9, %v316_v9  ;;  %v321_v12 = vpack.c.bf16 %v317_v10, %v317_v10 }
  0x7b   : > { %427 = vmatmul.bf16.vlgmr.msra.gmra.mxu0 %v320_v11  ;;  %440 = vmatmul.bf16.vlgmr.msra.gmra.mxu1 %v321_v12 }
  0xf8   : > { %v428_v14 = vpop.f32.mrf.mxu0  ;;  %v441_v15 = vpop.f32.mrf.mxu1 }
  0xf9   : > { %v429_v16 = vadd.f32 %v428_v14, %v322_v13 }
  0xfb   : > { %v442_v17 = vadd.f32 %v441_v15, %v429_v16 }
  0xfd   : > { %445 = vst [vmem:[%s223_s10] sm:$0x1] %v442_v17 }
  0xfe   : > { %833 = shalt.err (!%p830_p0)
}
  0xff   : > { %670 = dma.vmem_to_hbm [thread:$0]  (%p999_p5), %s458_s24, 16, %s460_s25, %s447_s26  }
 0x100   : > { %v430_v18 = vpop.f32.mrf.mxu0  ;;  %v443_v19 = vpop.f32.mrf.mxu1 }
 0x101 PF: > { %s471_s6 = sand.u32 1, %s872_s12   ;;  %p681_p3 = pnand %p550_p11, %p969_p6 }
 0x102   : > { %s472_s11 = scalar_lea.sflag [#allocation5], %s471_s6 }
 0x103   : > { %p682_p7 = pneg %p681_p3 }
 0x105   : > { %867 = dma.done.wait (%p682_p7), %s472_s11, 16  }
 0x106   : > { %869 = vsyncadd (%p682_p7), %s472_s11, 4294967280  ;;  %s20_s17 = sadd.s32 1, %s892_s17   ;;  %s1096_s12 = smov %s876_s13 }
 0x107   : > { %p17_p9 = scmp.ge.s32.totalorder %s20_s17, 4   ;;  %s1097_s13 = smov %s880_s14 }
 0x108   : > { %s1098_s14 = smov %s1008_s18  ;;  %s1099_s15 = smov %s888_s16 }
 0x109   : > { %s1100_s16 = smov %s1102_s5  ;;  %19 = sbr.rel (!%p17_p9) target bundleno = 9 (0x9), region = 89 }
 0x10e   :  { %477 = vsyncpa [#allocation4], 1 }
 0x10f   :  { %479 = vsyncpa [#allocation4 + $0x1], 1 }
 0x110   :  { %480 = vsyncpa [#allocation7], 1 }
 0x111   :  { %481 = vsyncpa [#allocation5], 1 }
 0x112   :  { %483 = vsyncpa [#allocation5 + $0x1], 1 }

</bundles_post_ra>
